<compile_context>
chip_gen: v7x
topology: tpu7x:2x2x1
jax: 0.10.0
libtpu: 0.0.40
codegen_flags: <defaults>
</compile_context>

<pallas_src>
import jax
import jax.numpy as jnp
from jax.experimental import pallas as pl
from jax.experimental.pallas import tpu as pltpu


# ----------------------------------------------------------------------------
# forward(x) = x  — pure pass-through, no kernel needed.
# ----------------------------------------------------------------------------
def vae_encoder_forward(x):
    """Exact semantics of VAEEncoder.forward: returns x unchanged (no DMA)."""
    return x


# ----------------------------------------------------------------------------
# Fused reparameterize + KL-divergence kernel.
# ----------------------------------------------------------------------------
def _fused_reparam_kl_kernel(mu_ref, logvar_ref, eps_ref, z_ref, klp_ref):
    mu = mu_ref[...].astype(jnp.float32)
    lv = logvar_ref[...].astype(jnp.float32)
    eps = eps_ref[...].astype(jnp.float32)

    # z = mu + eps * exp(0.5 * logvar)  (cast back to input dtype on store).
    std = jnp.exp(0.5 * lv)
    z_ref[...] = (mu + eps * std).astype(z_ref.dtype)

    # Per-element KL term; zero-padded entries contribute exactly 0:
    #   1 + 0 - 0 - exp(0) = 0.
    t = 1.0 + lv - mu * mu - jnp.exp(lv)
    # Reduce the tile's rows down to an (8, lanes) lane-dense partial block
    # (sublane-group sum; aligned with the (8,128) tiling, so it's cheap).
    klp_ref[...] = jnp.sum(t.reshape(-1, 8, t.shape[-1]), axis=0)


def vae_reparameterize_and_kl(mu, logvar, *, key=None, eps=None, beta=1.0,
                              reduction="sum", block_rows=256):
    """Fused reparameterize + divergence_loss.

    Returns (z, kl) where
      z  = mu + eps * exp(0.5 * logvar),  eps ~ N(0, 1)  (from `eps` or `key`),
      kl = beta * {sum | mean over batch} of
           -0.5 * sum_d(1 + logvar - mu^2 - exp(logvar)).
    """
    B, D = mu.shape

    # Lane-dense padding: rows -> multiple of 8 (sublanes), cols -> mult of 128.
    Dp = pl.cdiv(D, 128) * 128
    TB = max(8, (min(block_rows, pl.cdiv(B, 8) * 8) // 8) * 8)
    Bp = pl.cdiv(B, TB) * TB
    num_tiles = Bp // TB

    mu_p = jnp.pad(mu, ((0, Bp - B), (0, Dp - D)))
    lv_p = jnp.pad(logvar, ((0, Bp - B), (0, Dp - D)))

    if eps is None:
        if key is None:
            key = jax.random.PRNGKey(0)
        eps_p = jax.random.normal(key, (Bp, Dp), dtype=jnp.float32)
    else:
        eps_p = jnp.pad(eps.astype(jnp.float32), ((0, Bp - B), (0, Dp - D)))

    z_p, klp = pl.pallas_call(
        _fused_reparam_kl_kernel,
        grid=(num_tiles,),
        in_specs=[
            pl.BlockSpec((TB, Dp), lambda i: (i, 0)),        # mu tile
            pl.BlockSpec((TB, Dp), lambda i: (i, 0)),        # logvar tile
            pl.BlockSpec((TB, Dp), lambda i: (i, 0)),        # eps tile
        ],
        out_specs=(
            pl.BlockSpec((TB, Dp), lambda i: (i, 0)),        # z tile
            pl.BlockSpec((8, Dp), lambda i: (i, 0)),         # KL partials
        ),
        out_shape=(
            jax.ShapeDtypeStruct((Bp, Dp), mu.dtype),
            jax.ShapeDtypeStruct((num_tiles * 8, Dp), jnp.float32),
        ),
        compiler_params=pltpu.CompilerParams(
            dimension_semantics=("parallel",),
            vmem_limit_bytes=32 * 1024 * 1024,
        ),
    )(mu_p, lv_p, eps_p)

    z = z_p[:B, :D]
    kl = (-0.5 * beta) * jnp.sum(klp)                        # tiny finish-off
    if reduction != "sum":
        kl = kl / B                                          # 'mean' over batch
    return z, kl


# Thin API-parity wrappers (the fused call above is the intended hot path).
def vae_reparameterize(mu, logvar, key):
    z, _ = vae_reparameterize_and_kl(mu, logvar, key=key)
    return z


def vae_divergence_loss(mu, logvar, beta=1.0, reduction="sum"):
    _, kl = vae_reparameterize_and_kl(mu, logvar, key=jax.random.PRNGKey(0),
                                      beta=beta, reduction=reduction)
    return kl


# TODO(synk): predict_fn is host-side numpy/device glue around forward(); no
# on-chip compute to translate.

if __name__ == "__main__":
    latent_dim = 20  # module default
    key = jax.random.PRNGKey(0)
    kx, kmu, klv, keps, k2 = jax.random.split(key, 5)

    # Small shapes consistent with the module.
    B = 2
    x = jax.random.normal(kx, (B, 4, 16, 16), dtype=jnp.float32)   # NCHW
    mu = jax.random.normal(kmu, (B, latent_dim), dtype=jnp.float32)
    logvar = 0.1 * jax.random.normal(klv, (B, latent_dim), dtype=jnp.float32)

    # forward(): identity (no kernel -> no HBM round-trip).
    y = vae_encoder_forward(x)
    jax.block_until_ready(y)
    assert y.shape == x.shape and y.dtype == x.dtype
    assert bool(jnp.allclose(y, x))

    # Fused reparameterize + divergence_loss (kws_loss defaults: sum, beta=1),
    # with eps supplied explicitly so z can be checked exactly.
    eps = jax.random.normal(keps, (B, latent_dim), dtype=jnp.float32)
    z, kl = vae_reparameterize_and_kl(mu, logvar, eps=eps, beta=1.0,
                                      reduction="sum")
    jax.block_until_ready((z, kl))
    assert z.shape == mu.shape and z.dtype == mu.dtype

    # z matches the reference reparameterization exactly.
    z_ref = mu + eps * jnp.exp(0.5 * logvar)
    assert bool(jnp.allclose(z, z_ref, rtol=1e-6, atol=1e-6))

    # KL matches the reference (independent of eps).
    kl_ref = jnp.sum(-0.5 * jnp.sum(1.0 + logvar - mu**2 - jnp.exp(logvar),
                                    axis=-1))
    assert bool(jnp.allclose(kl, kl_ref, rtol=1e-5, atol=1e-5))

    # With std -> 0, z == mu exactly (key-generated eps path).
    z0, _ = vae_reparameterize_and_kl(mu, jnp.full_like(logvar, -80.0), key=k2)
    jax.block_until_ready(z0)
    assert bool(jnp.allclose(z0, mu, atol=1e-5))

    # Multi-tile + padded-batch path: B not a multiple of the tile size.
    Bb = 260
    kmu2, klv2, keps2 = jax.random.split(jax.random.PRNGKey(1), 3)
    mu2 = jax.random.normal(kmu2, (Bb, latent_dim), dtype=jnp.float32)
    lv2 = 0.1 * jax.random.normal(klv2, (Bb, latent_dim), dtype=jnp.float32)
    eps2 = jax.random.normal(keps2, (Bb, latent_dim), dtype=jnp.float32)
    z2, kl2 = vae_reparameterize_and_kl(mu2, lv2, eps=eps2, block_rows=128)
    jax.block_until_ready((z2, kl2))
    z2_ref = mu2 + eps2 * jnp.exp(0.5 * lv2)
    kl2_ref = jnp.sum(-0.5 * jnp.sum(1.0 + lv2 - mu2**2 - jnp.exp(lv2),
                                     axis=-1))
    assert bool(jnp.allclose(z2, z2_ref, rtol=1e-5, atol=1e-5))
    assert bool(jnp.allclose(kl2, kl2_ref, rtol=1e-4, atol=1e-4))

    # 'mean' reduction path with beta != 1.
    _, kl_mean = vae_reparameterize_and_kl(mu, logvar, eps=eps, beta=2.0,
                                           reduction="mean")
    jax.block_until_ready(kl_mean)
    assert bool(jnp.allclose(kl_mean, 2.0 * kl_ref / B, rtol=1e-5, atol=1e-5))

    print("KERNEL_OK")
</pallas_src>

<mosaic_0001>
module attributes {stable_mosaic.version = 11 : i64} {
  func.func @_fused_reparam_kl_kernel(%arg0: i32, %arg1: memref<8x128xf32, #tpu.memory_space<vmem>>, %arg2: memref<8x128xf32, #tpu.memory_space<vmem>>, %arg3: memref<8x128xf32, #tpu.memory_space<vmem>>, %arg4: memref<8x128xf32, #tpu.memory_space<vmem>>, %arg5: memref<8x128xf32, #tpu.memory_space<vmem>>) attributes {dimension_semantics = [#tpu.dimension_semantics<parallel>], iteration_bounds = array<i64: 1>, scalar_prefetch = 0 : i64, scratch_operands = 0 : i64, tpu.core_type = #tpu.core_type<tc>, window_params = [{transform_indices = @transform_0, window_bounds = array<i64: 8, 128>}, {transform_indices = @transform_1, window_bounds = array<i64: 8, 128>}, {transform_indices = @transform_2, window_bounds = array<i64: 8, 128>}, {transform_indices = @transform_3, window_bounds = array<i64: 8, 128>}, {transform_indices = @transform_4, window_bounds = array<i64: 8, 128>}]} {
    %c0 = arith.constant 0 : index
    %c0_0 = arith.constant 0 : index
    %0 = vector.load %arg1[%c0, %c0_0] : memref<8x128xf32, #tpu.memory_space<vmem>>, vector<8x128xf32>
    %c0_1 = arith.constant 0 : index
    %c0_2 = arith.constant 0 : index
    %1 = vector.load %arg2[%c0_1, %c0_2] : memref<8x128xf32, #tpu.memory_space<vmem>>, vector<8x128xf32>
    %c0_3 = arith.constant 0 : index
    %c0_4 = arith.constant 0 : index
    %2 = vector.load %arg3[%c0_3, %c0_4] : memref<8x128xf32, #tpu.memory_space<vmem>>, vector<8x128xf32>
    %cst = arith.constant 5.000000e-01 : f32
    %3 = vector.broadcast %cst : f32 to vector<8x128xf32>
    %4 = arith.mulf %3, %1 : vector<8x128xf32>
    %5 = math.exp %4 : vector<8x128xf32>
    %6 = arith.mulf %2, %5 : vector<8x128xf32>
    %7 = arith.addf %0, %6 : vector<8x128xf32>
    %c0_5 = arith.constant 0 : index
    %c0_6 = arith.constant 0 : index
    %8 = vector.load %arg4[%c0_5, %c0_6] : memref<8x128xf32, #tpu.memory_space<vmem>>, vector<8x128xf32>
    tpu.vector_store %arg4[%c0_5, %c0_6], %7 {strides = array<i32>} : memref<8x128xf32, #tpu.memory_space<vmem>>, vector<8x128xf32>,
    %cst_7 = arith.constant 1.000000e+00 : f32
    %9 = vector.broadcast %cst_7 : f32 to vector<8x128xf32>
    %10 = arith.addf %9, %1 : vector<8x128xf32>
    %11 = arith.mulf %0, %0 : vector<8x128xf32>
    %12 = arith.subf %10, %11 : vector<8x128xf32>
    %13 = math.exp %1 : vector<8x128xf32>
    %14 = arith.subf %12, %13 : vector<8x128xf32>
    %15 = vector.shape_cast %14 : vector<8x128xf32> to vector<1x8x128xf32>
    %cst_8 = arith.constant dense<0.000000e+00> : vector<8x128xf32>
    %16 = vector.multi_reduction <add>, %15, %cst_8 [0] : vector<1x8x128xf32> to vector<8x128xf32>
    %c0_9 = arith.constant 0 : index
    %c0_10 = arith.constant 0 : index
    %17 = vector.load %arg5[%c0_9, %c0_10] : memref<8x128xf32, #tpu.memory_space<vmem>>, vector<8x128xf32>
    tpu.vector_store %arg5[%c0_9, %c0_10], %16 {strides = array<i32>} : memref<8x128xf32, #tpu.memory_space<vmem>>, vector<8x128xf32>,
    return
  }
  func.func @transform_0(%arg0: i32) -> (i32, i32) {
    %c0_i32 = arith.constant 0 : i32
    %c0_i32_0 = arith.constant 0 : i32
    return %arg0, %c0_i32 : i32, i32
  }
  func.func @transform_1(%arg0: i32) -> (i32, i32) {
    %c0_i32 = arith.constant 0 : i32
    %c0_i32_0 = arith.constant 0 : i32
    return %arg0, %c0_i32 : i32, i32
  }
  func.func @transform_2(%arg0: i32) -> (i32, i32) {
    %c0_i32 = arith.constant 0 : i32
    %c0_i32_0 = arith.constant 0 : i32
    return %arg0, %c0_i32 : i32, i32
  }
  func.func @transform_3(%arg0: i32) -> (i32, i32) {
    %c0_i32 = arith.constant 0 : i32
    %c0_i32_0 = arith.constant 0 : i32
    return %arg0, %c0_i32 : i32, i32
  }
  func.func @transform_4(%arg0: i32) -> (i32, i32) {
    %c0_i32 = arith.constant 0 : i32
    %c0_i32_0 = arith.constant 0 : i32
    return %arg0, %c0_i32 : i32, i32
  }
}

</mosaic_0001>

<bundles_post_ra>
// kernel: tpu_custom_call.1
= control target key start
LH: loop header
LB: loop body
LE: loop exit
PB: predicated region body
PF: predicated region fallthrough
CT: control target
= control target key end

     0   :  { %10 = vsyncpa [#allocation3], 0  ;;  %s317_s0 = inlined_call_operand.hbm [shape: f32[8,128], index: 0, kind: input, shape index: {}]   ;;  %s318_s1 = inlined_call_operand.hbm [shape: f32[8,128], index: 1, kind: input, shape index: {}]   ;;  %s319_s2 = inlined_call_operand.hbm [shape: f32[8,128], index: 2, kind: input, shape index: {}]   ;;  %s320_s3 = inlined_call_operand.hbm [shape: f32[8,128], index: 3, kind: output, shape index: {0}]   ;;  %s321_s4 = inlined_call_operand.hbm [shape: f32[8,128], index: 4, kind: output, shape index: {1}]  }
   0x1   :  { %11 = vsyncpa [#allocation6], 0 }
   0x2   :  { %12 = vsyncpa [#allocation4], 0 }
   0x3   :  { %13 = vsyncpa [#allocation10], 0  ;;  %s227_s15 = smov [#allocation5]   ;;  %s228_s17 = smov [#allocation2]  }
   0x4   :  { %s30_s16 = sshll.u32 %s227_s15, 4  ;;  %s20_s18 = sshll.u32 %s228_s17, 4  ;;  %s31_s16 = int_to_ptr.vmem [resolvable:$true] %s30_s16  ;;  %s21_s18 = int_to_ptr.vmem [resolvable:$true] %s20_s18 }
   0x5   :  { %s109_s21 = scalar_lea.hbm %s318_s1, 128 }
   0x6   :  { %p110_p0 = scmp.ne.s32.totalorder %s318_s1, %s109_s21  ;;  %p113_p1 = scmp.lt.u32.totalorder %s109_s21, %s318_s1 }
   0x8   :  { %p115_p2 = pnand %p113_p1, %p110_p0 }
   0xa   :  { %118 = shalt.err (!%p115_p2)
}
   0xb   :  { %s119_s26 = scalar_lea.vmem %s31_s16, 128  ;;  %p124_p4 = scmp.lt.s32.totalorder %s31_s16, %s31_s16 }
   0xc   :  { %p120_p3 = scmp.ne.s32.totalorder %s31_s16, %s119_s26  ;;  %p125_p5 = scmp.lt.s32.totalorder %s119_s26, %s119_s26 }
   0xe   :  { %p126_p6 = por %p125_p5, %p124_p4 }
  0x10   :  { %p127_p7 = pnand %p126_p6, %p120_p3 }
  0x12   :  { %130 = shalt.err (!%p127_p7)
}
  0x13   :  { %33 = dma.hbm_to_vmem [thread:$0]  %s318_s1, 128, %s31_s16, [#allocation6]  }
  0x14   :  { %s131_s5 = scalar_lea.hbm %s317_s0, 128 }
  0x15   :  { %p132_p8 = scmp.ne.s32.totalorder %s317_s0, %s131_s5  ;;  %p135_p9 = scmp.lt.u32.totalorder %s131_s5, %s317_s0 }
  0x17   :  { %p137_p10 = pnand %p135_p9, %p132_p8 }
  0x19   :  { %140 = shalt.err (!%p137_p10)
}
  0x1a   :  { %s141_s10 = scalar_lea.vmem %s21_s18, 128  ;;  %p146_p12 = scmp.lt.s32.totalorder %s21_s18, %s21_s18 }
  0x1b   :  { %p142_p11 = scmp.ne.s32.totalorder %s21_s18, %s141_s10  ;;  %p147_p13 = scmp.lt.s32.totalorder %s141_s10, %s141_s10 }
  0x1d   :  { %p148_p0 = por %p147_p13, %p146_p12 }
  0x1f   :  { %p149_p1 = pnand %p148_p0, %p142_p11 }
  0x21   :  { %152 = shalt.err (!%p149_p1)
}
  0x22   :  { %23 = dma.hbm_to_vmem [thread:$0]  %s317_s0, 128, %s21_s18, [#allocation3]  }
  0x23   :  { %s229_s12 = smov [#allocation7]   ;;  %s153_s16 = scalar_lea.hbm %s319_s2, 128 }
  0x24   :  { %s40_s13 = sshll.u32 %s229_s12, 4  ;;  %p154_p2 = scmp.ne.s32.totalorder %s319_s2, %s153_s16  ;;  %s41_s13 = int_to_ptr.vmem [resolvable:$true] %s40_s13 }
  0x25   :  { %p157_p3 = scmp.lt.u32.totalorder %s153_s16, %s319_s2 }
  0x27   :  { %p159_p4 = pnand %p157_p3, %p154_p2 }
  0x29   :  { %162 = shalt.err (!%p159_p4)
}
  0x2a   :  { %s163_s22 = scalar_lea.vmem %s41_s13, 128  ;;  %p168_p6 = scmp.lt.s32.totalorder %s41_s13, %s41_s13 }
  0x2b   :  { %p164_p5 = scmp.ne.s32.totalorder %s41_s13, %s163_s22  ;;  %p169_p7 = scmp.lt.s32.totalorder %s163_s22, %s163_s22 }
  0x2d   :  { %p170_p8 = por %p169_p7, %p168_p6 }
  0x2f   :  { %p171_p9 = pnand %p170_p8, %p164_p5 }
  0x31   :  { %174 = shalt.err (!%p171_p9)
}
  0x32   :  { %43 = dma.hbm_to_vmem [thread:$0]  %s319_s2, 128, %s41_s13, [#allocation6]  }
  0x33   :  { %219 = dma.done.wait [#allocation3], 128  }
  0x34   :  { %220 = vsyncadd [#allocation3], 4294967168 }
  0x35   :  { %221 = dma.done.wait [#allocation6], 256  }
  0x36   :  { %222 = vsyncadd [#allocation6], 4294967040  ;;  %v54_v0 = vld [vmem:[#allocation5] sm:$0xff]  ;;  %v53_v3 = vld [vmem:[#allocation2] sm:$0xff]  ;;  %s230_s23 = smov [#allocation9]   ;;  %s231_s2 = smov [#allocation8]  }
  0x37   :  { %v56_v1 = vmul.f32 0.5, %v54_v0  ;;  %v65_v2 = vmul.f32 1.442695, %v54_v0  ;;  %v63_v5 = vmul.f32 %v53_v3, %v53_v3  ;;  %v62_v6 = vadd.f32 1.0, %v54_v0  ;;  %s86_s24 = sshll.u32 %s230_s23, 4  ;;  %v55_v9 = vld [vmem:[#allocation7] sm:$0xff]  ;;  %s87_s24 = int_to_ptr.vmem [resolvable:$true] %s86_s24 }
  0x38   :  { %s76_s25 = sshll.u32 %s231_s2, 4  ;;  %s175_s26 = scalar_lea.vmem %s87_s24, 128  ;;  %s77_s25 = int_to_ptr.vmem [resolvable:$true] %s76_s25 }
  0x39   :  { %v57_v4 = vmul.f32 1.442695, %v56_v1  ;;  %105 = vpow2.f32 %v65_v2  ;;  %v64_v7 = vsub.f32 %v62_v6, %v63_v5  ;;  %p176_p10 = scmp.ne.s32.totalorder %s87_s24, %s175_s26  ;;  %p180_p11 = scmp.lt.s32.totalorder %s87_s24, %s87_s24 }
  0x3a   :  { %p181_p12 = scmp.lt.s32.totalorder %s175_s26, %s175_s26 }
  0x3b   :  { %107 = vpow2.f32 %v57_v4 }
  0x3c   :  { %p182_p13 = por %p181_p12, %p180_p11 }
  0x3e   :  { %p183_p0 = pnand %p182_p13, %p176_p10 }
  0x43   :  { %v106_v8 = vpop.eup %105 }
  0x44   :  { %v67_v10 = vsub.f32 %v64_v7, %v106_v8 }
  0x45   :  { %v108_v11 = vpop.eup %107 }
  0x46   :  { %v59_v12 = vmul.f32 %v108_v11, %v55_v9  ;;  %69 = vst [vmem:[#allocation9] sm:$0xff] %v67_v10 }
  0x47   :  { %186 = shalt.err (!%p183_p0)
}
  0x48   :  { %s187_s29 = scalar_lea.hbm %s321_s4, 128 }
  0x49   :  { %p188_p1 = scmp.ne.s32.totalorder %s321_s4, %s187_s29  ;;  %p191_p2 = scmp.lt.u32.totalorder %s187_s29, %s321_s4 }
  0x4b   :  { %p193_p3 = pnand %p191_p2, %p188_p1 }
  0x4d   :  { %196 = shalt.err (!%p193_p3)
}
  0x4e   :  { %89 = dma.vmem_to_hbm [thread:$0]  %s87_s24, 128, %s321_s4, [#allocation10]   ;;  %v60_v13 = vadd.f32 %v59_v12, %v53_v3 }
  0x4f   :  { %s197_s10 = scalar_lea.vmem %s77_s25, 128  ;;  %p202_p5 = scmp.lt.s32.totalorder %s77_s25, %s77_s25 }
  0x50   :  { %61 = vst [vmem:[#allocation8] sm:$0xff] %v60_v13  ;;  %p198_p4 = scmp.ne.s32.totalorder %s77_s25, %s197_s10  ;;  %p203_p6 = scmp.lt.s32.totalorder %s197_s10, %s197_s10 }
  0x52   :  { %p204_p7 = por %p203_p6, %p202_p5 }
  0x54   :  { %p205_p8 = pnand %p204_p7, %p198_p4 }
  0x56   :  { %208 = shalt.err (!%p205_p8)
}
  0x57   :  { %s209_s12 = scalar_lea.hbm %s320_s3, 128 }
  0x58   :  { %p210_p9 = scmp.ne.s32.totalorder %s320_s3, %s209_s12  ;;  %p213_p10 = scmp.lt.u32.totalorder %s209_s12, %s320_s3 }
  0x5a   :  { %p215_p11 = pnand %p213_p10, %p210_p9 }
  0x5c   :  { %218 = shalt.err (!%p215_p11)
}
  0x5d   :  { %79 = dma.vmem_to_hbm [thread:$0]  %s77_s25, 128, %s320_s3, [#allocation4]  }
  0x5e   :  { %223 = dma.done.wait [#allocation4], 128  }
  0x5f   :  { %224 = vsyncadd [#allocation4], 4294967168 }
  0x60   :  { %225 = dma.done.wait [#allocation10], 128  }
  0x61   :  { %226 = vsyncadd [#allocation10], 4294967168 }
  0x62   :  { %96 = vsyncpa [#allocation3], 1 }
  0x63   :  { %97 = vsyncpa [#allocation6], 1 }
  0x64   :  { %98 = vsyncpa [#allocation4], 1 }
  0x65   :  { %99 = vsyncpa [#allocation10], 1 }

</bundles_post_ra>
